<compile_context>
chip_gen: v5e
topology: v5e:2x2
jax: 0.10.0
libtpu: 0.0.40
codegen_flags: <defaults>
</compile_context>

<pallas_src>
import functools

import jax
import jax.numpy as jnp
from jax.experimental import pallas as pl
from jax.experimental.pallas import tpu as pltpu

LN_EPS = 1e-5


def _round_down(n, m):
    return (n // m) * m


def _vmem_capacity_bytes():
    """Physical VMEM of the current chip; falls back to 128 MiB (v5e/v6e)."""
    try:
        info = pltpu.get_tpu_info()
        cap = int(getattr(info, "vmem_capacity_bytes"))
        if cap > 0:
            return cap
    except Exception:
        pass
    return 128 * 1024 * 1024


# --------------------------------------------------------------------------
# Kernels
# --------------------------------------------------------------------------
def _prenorm_linear_kernel(x_ref, gamma_ref, beta_ref, wt_ref, b_ref, o_ref):
    """Fused LayerNorm + Linear; W fully resident (one grid axis over rows)."""
    x = x_ref[...].astype(jnp.float32)                       # (tm, D)
    # LayerNorm over the last axis (biased variance, like torch.nn.LayerNorm),
    # statistics in f32 regardless of input dtype.
    mean = jnp.mean(x, axis=-1, keepdims=True)
    xc = x - mean
    var = jnp.mean(xc * xc, axis=-1, keepdims=True)
    inv = jax.lax.rsqrt(var + LN_EPS)
    y = (xc * inv) * gamma_ref[...] + beta_ref[...]          # gamma/beta are f32
    # fn = Linear: y @ W^T + b (W pre-transposed to (D, D_out) at init time).
    y = y.astype(wt_ref.dtype)
    out = jnp.dot(y, wt_ref[...], preferred_element_type=jnp.float32)
    out = out + b_ref[...]                                   # f32 bias
    o_ref[...] = out.astype(o_ref.dtype)


def _prenorm_linear_kernel_coltiled(x_ref, gamma_ref, beta_ref, wt_ref, b_ref,
                                    o_ref, y_ref):
    """Column-tiled variant: LayerNorm computed once per row tile and cached
    in the y_ref VMEM scratch, reused for every column tile j > 0."""
    @pl.when(pl.program_id(1) == 0)
    def _():
        x = x_ref[...].astype(jnp.float32)
        mean = jnp.mean(x, axis=-1, keepdims=True)
        xc = x - mean
        var = jnp.mean(xc * xc, axis=-1, keepdims=True)
        inv = jax.lax.rsqrt(var + LN_EPS)
        y = (xc * inv) * gamma_ref[...] + beta_ref[...]
        y_ref[...] = y.astype(y_ref.dtype)

    out = jnp.dot(y_ref[...], wt_ref[...], preferred_element_type=jnp.float32)
    out = out + b_ref[...]
    o_ref[...] = out.astype(o_ref.dtype)


# --------------------------------------------------------------------------
# Wrapper
# --------------------------------------------------------------------------
def init_prenorm_linear_params(gamma, beta, w, b):
    """One-time (parameter-init time) prep, hoisted out of the per-call path:
    W transposed to (D, D_out), gamma/beta/bias reshaped & cast to f32."""
    D_out, D = w.shape
    return {
        "gamma": jnp.asarray(gamma).reshape(1, D).astype(jnp.float32),
        "beta": jnp.asarray(beta).reshape(1, D).astype(jnp.float32),
        "wt": jnp.asarray(w).T,                               # (D, D_out)
        "b": jnp.asarray(b).reshape(1, D_out).astype(jnp.float32),
    }


def prenorm_linear(x, params, *, block_rows=None, col_tile=None):
    """x: (..., D); params from init_prenorm_linear_params. Returns (..., D_out)."""
    gamma2, beta2, wt, b2 = params["gamma"], params["beta"], params["wt"], params["b"]
    *lead, D = x.shape
    assert wt.shape[0] == D, "weight / input dim mismatch"
    D_out = wt.shape[1]
    N = 1
    for s in lead:
        N *= s
    x2 = x.reshape(N, D)

    x_isz = jnp.dtype(x.dtype).itemsize
    w_isz = jnp.dtype(wt.dtype).itemsize
    o_isz = x_isz  # output in x dtype

    # ---- generation-aware VMEM budget ----
    cap = _vmem_capacity_bytes()
    small_vmem = cap <= 96 * 1024 * 1024          # v7x class (64 MiB physical)
    usable = int(cap * (0.80 if small_vmem else 0.78))

    if block_rows is None:
        if small_vmem:
            block_rows = 256                       # v7x: keep double-buffered, no spill
        else:
            block_rows = 512 if x_isz >= 4 else 1024   # v5e/v6e: 128 MiB headroom

    param_bytes = 4 * (2 * D + D_out) * 4          # gamma/beta/bias (+ buffers), tiny
    slack = 2 * 1024 * 1024

    # ---- Path 1: fully resident W (constant index_map -> DMA'd from HBM once) ----
    resident = col_tile is None
    tm = None
    if resident:
        fixed = 2 * D * D_out * w_isz + param_bytes + slack     # W (2 bufs, conservative)
        row_cost = (2 * D * x_isz                                # x tile, double-buffered
                    + 2 * D_out * o_isz                          # out tile, double-buffered
                    + 3 * D * 4                                  # f32 temps: x, xc, y
                    + D_out * 4)                                 # f32 accum before cast
        avail = usable - fixed
        if avail >= 8 * row_cost:
            tm = min(block_rows, N, avail // row_cost)
            if tm < N:
                tm = max(8, _round_down(tm, 8))
        else:
            resident = False                                     # W too big: column-tile

    if resident:
        grid = (pl.cdiv(N, tm),)                                 # boundary block masked
        out2 = pl.pallas_call(
            _prenorm_linear_kernel,
            out_shape=jax.ShapeDtypeStruct((N, D_out), x.dtype),
            grid_spec=pltpu.PrefetchScalarGridSpec(
                num_scalar_prefetch=0,
                grid=grid,
                in_specs=[
                    pl.BlockSpec((tm, D), lambda i: (i, 0)),      # x row tile
                    pl.BlockSpec((1, D), lambda i: (0, 0)),       # gamma (loop-invariant)
                    pl.BlockSpec((1, D), lambda i: (0, 0)),       # beta
                    pl.BlockSpec((D, D_out), lambda i: (0, 0)),   # W^T resident: 1 HBM read
                    pl.BlockSpec((1, D_out), lambda i: (0, 0)),   # bias
                ],
                out_specs=pl.BlockSpec((tm, D_out), lambda i: (i, 0)),
            ),
            compiler_params=pltpu.CompilerParams(
                dimension_semantics=("parallel",),
                vmem_limit_bytes=usable),
        )(x2, gamma2, beta2, wt, b2)
    else:
        # ---- Path 2: column-tiled W, LN cached per row tile in VMEM scratch ----
        if col_tile is not None:
            tn = col_tile
        elif D_out >= 1024:
            tn = 512
        elif D_out >= 512:
            tn = 256
        else:
            tn = 128
        tn = min(tn, D_out)
        fixed = 2 * D * tn * w_isz + param_bytes + slack
        row_cost = (2 * D * x_isz + 2 * tn * o_isz
                    + D * w_isz                                   # y scratch (MXU dtype)
                    + 3 * D * 4 + tn * 4)
        avail = max(usable - fixed, 8 * row_cost)
        tm = min(block_rows, N, avail // row_cost)
        if tm < N:
            tm = max(8, _round_down(tm, 8))
        grid = (pl.cdiv(N, tm), pl.cdiv(D_out, tn))
        out2 = pl.pallas_call(
            _prenorm_linear_kernel_coltiled,
            out_shape=jax.ShapeDtypeStruct((N, D_out), x.dtype),
            grid_spec=pltpu.PrefetchScalarGridSpec(
                num_scalar_prefetch=0,
                grid=grid,
                in_specs=[
                    pl.BlockSpec((tm, D), lambda i, j: (i, 0)),   # x (invariant in j)
                    pl.BlockSpec((1, D), lambda i, j: (0, 0)),    # gamma
                    pl.BlockSpec((1, D), lambda i, j: (0, 0)),    # beta
                    pl.BlockSpec((D, tn), lambda i, j: (0, j)),   # W^T column tile
                    pl.BlockSpec((1, tn), lambda i, j: (0, j)),   # bias column tile
                ],
                out_specs=pl.BlockSpec((tm, tn), lambda i, j: (i, j)),
                scratch_shapes=[pltpu.VMEM((tm, D), wt.dtype)],   # cached normalized y
            ),
            # rows "parallel" (v7x megacore), columns "arbitrary" (reuse LN cache)
            compiler_params=pltpu.CompilerParams(
                dimension_semantics=("parallel", "arbitrary"),
                vmem_limit_bytes=usable),
        )(x2, gamma2, beta2, wt, b2)

    return out2.reshape(*lead, D_out)


def prenorm_linear_ref(x, gamma, beta, w, b):
    """Pure-JAX reference matching torch: fn(LayerNorm(x))."""
    xf = x.astype(jnp.float32)
    mean = jnp.mean(xf, axis=-1, keepdims=True)
    var = jnp.mean((xf - mean) ** 2, axis=-1, keepdims=True)
    y = (xf - mean) * jax.lax.rsqrt(var + LN_EPS) * gamma.astype(jnp.float32) \
        + beta.astype(jnp.float32)
    out = y @ w.astype(jnp.float32).T + b.astype(jnp.float32)
    return out.astype(x.dtype)


if __name__ == "__main__":
    key = jax.random.PRNGKey(0)
    keys = jax.random.split(key, 12)

    call = jax.jit(prenorm_linear, static_argnames=("block_rows", "col_tile"))

    # --- 1) small shapes consistent with the module: (batch, seq, dim) ---
    B, S, D = 2, 8, 32
    x = jax.random.normal(keys[0], (B, S, D), dtype=jnp.float32)
    gamma = 1.0 + 0.1 * jax.random.normal(keys[1], (D,), dtype=jnp.float32)
    beta = 0.05 * jax.random.normal(keys[2], (D,), dtype=jnp.float32)
    w = jax.random.normal(keys[3], (D, D), dtype=jnp.float32) * 0.05
    b = jax.random.normal(keys[4], (D,), dtype=jnp.float32) * 0.01

    params = init_prenorm_linear_params(gamma, beta, w, b)   # one-time prep
    out = jax.block_until_ready(call(x, params))
    ref = prenorm_linear_ref(x, gamma, beta, w, b)
    assert out.shape == (B, S, D)
    assert jnp.allclose(out, ref, atol=1e-5, rtol=1e-5), "mismatch (small)"

    # --- 2) non-divisible row count: no padding, boundary block store is masked ---
    B2, S2, D2 = 2, 300, 128                                  # N = 600
    x2 = jax.random.normal(keys[5], (B2, S2, D2), dtype=jnp.float32)
    gamma2 = 1.0 + 0.1 * jax.random.normal(keys[6], (D2,), dtype=jnp.float32)
    beta2 = 0.05 * jax.random.normal(keys[7], (D2,), dtype=jnp.float32)
    w2 = jax.random.normal(keys[8], (D2, D2), dtype=jnp.float32) * 0.03
    b2 = jax.random.normal(keys[9], (D2,), dtype=jnp.float32) * 0.01

    params2 = init_prenorm_linear_params(gamma2, beta2, w2, b2)
    out2 = jax.block_until_ready(call(x2, params2))
    ref2 = prenorm_linear_ref(x2, gamma2, beta2, w2, b2)
    assert out2.shape == (B2, S2, D2)
    assert jnp.allclose(out2, ref2, atol=1e-4, rtol=1e-4), "mismatch (boundary)"

    # --- 3) force the column-tiled path (LN cached in VMEM scratch across j) ---
    B3, S3, D3 = 2, 64, 256
    x3 = jax.random.normal(keys[10], (B3, S3, D3), dtype=jnp.float32)
    w3 = jax.random.normal(keys[11], (D3, D3), dtype=jnp.float32) * 0.02
    gamma3 = 1.0 + 0.1 * jax.random.normal(keys[6], (D3,), dtype=jnp.float32)
    beta3 = 0.05 * jax.random.normal(keys[7], (D3,), dtype=jnp.float32)
    b3 = jax.random.normal(keys[9], (D3,), dtype=jnp.float32) * 0.01

    params3 = init_prenorm_linear_params(gamma3, beta3, w3, b3)
    out3 = jax.block_until_ready(call(x3, params3, col_tile=128))
    ref3 = prenorm_linear_ref(x3, gamma3, beta3, w3, b3)
    assert out3.shape == (B3, S3, D3)
    assert jnp.allclose(out3, ref3, atol=1e-4, rtol=1e-4), "mismatch (col-tiled)"

    # TODO(synk): `fn` is arbitrary in the original module; it is fixed here to a
    # deterministic Linear(dim, dim) since the wrapped sub-module is not specified.
    print("KERNEL_OK")
</pallas_src>

<mosaic_0001>
module attributes {stable_mosaic.version = 11 : i64} {
  func.func @_prenorm_linear_kernel(%arg0: i32, %arg1: memref<16x32xf32, #tpu.memory_space<vmem>>, %arg2: memref<1x32xf32, #tpu.memory_space<vmem>>, %arg3: memref<1x32xf32, #tpu.memory_space<vmem>>, %arg4: memref<32x32xf32, #tpu.memory_space<vmem>>, %arg5: memref<1x32xf32, #tpu.memory_space<vmem>>, %arg6: memref<16x32xf32, #tpu.memory_space<vmem>>) attributes {dimension_semantics = [#tpu.dimension_semantics<parallel>], iteration_bounds = array<i64: 1>, scalar_prefetch = 0 : i64, scratch_operands = 0 : i64, tpu.core_type = #tpu.core_type<tc>, window_params = [{transform_indices = @transform_0, window_bounds = array<i64: 16, 32>}, {pipeline_mode = #tpu.pipeline_mode<synchronous>, transform_indices = @transform_1, window_bounds = array<i64: 1, 32>}, {pipeline_mode = #tpu.pipeline_mode<synchronous>, transform_indices = @transform_2, window_bounds = array<i64: 1, 32>}, {pipeline_mode = #tpu.pipeline_mode<synchronous>, transform_indices = @transform_3, window_bounds = array<i64: 32, 32>}, {pipeline_mode = #tpu.pipeline_mode<synchronous>, transform_indices = @transform_4, window_bounds = array<i64: 1, 32>}, {transform_indices = @transform_5, window_bounds = array<i64: 16, 32>}]} {
    %c0 = arith.constant 0 : index
    %c0_0 = arith.constant 0 : index
    %0 = vector.load %arg1[%c0, %c0_0] : memref<16x32xf32, #tpu.memory_space<vmem>>, vector<16x32xf32>
    %cst = arith.constant dense<0.000000e+00> : vector<16xf32>
    %1 = vector.multi_reduction <add>, %0, %cst [1] : vector<16x32xf32> to vector<16xf32>
    %2 = vector.shape_cast %1 : vector<16xf32> to vector<16x1xf32>
    %cst_1 = arith.constant 3.200000e+01 : f32
    %3 = vector.broadcast %cst_1 : f32 to vector<16x1xf32>
    %4 = arith.divf %2, %3 : vector<16x1xf32>
    %5 = vector.broadcast %4 : vector<16x1xf32> to vector<16x32xf32>
    %6 = arith.subf %0, %5 : vector<16x32xf32>
    %7 = arith.mulf %6, %6 : vector<16x32xf32>
    %cst_2 = arith.constant dense<0.000000e+00> : vector<16xf32>
    %8 = vector.multi_reduction <add>, %7, %cst_2 [1] : vector<16x32xf32> to vector<16xf32>
    %9 = vector.shape_cast %8 : vector<16xf32> to vector<16x1xf32>
    %cst_3 = arith.constant 3.200000e+01 : f32
    %10 = vector.broadcast %cst_3 : f32 to vector<16x1xf32>
    %11 = arith.divf %9, %10 : vector<16x1xf32>
    %cst_4 = arith.constant 9.99999974E-6 : f32
    %12 = vector.broadcast %cst_4 : f32 to vector<16x1xf32>
    %13 = arith.addf %11, %12 : vector<16x1xf32>
    %14 = math.rsqrt %13 : vector<16x1xf32>
    %15 = vector.broadcast %14 : vector<16x1xf32> to vector<16x32xf32>
    %16 = arith.mulf %6, %15 : vector<16x32xf32>
    %c0_5 = arith.constant 0 : index
    %c0_6 = arith.constant 0 : index
    %17 = vector.load %arg2[%c0_5, %c0_6] : memref<1x32xf32, #tpu.memory_space<vmem>>, vector<1x32xf32>
    %18 = vector.broadcast %17 : vector<1x32xf32> to vector<16x32xf32>
    %19 = arith.mulf %16, %18 : vector<16x32xf32>
    %c0_7 = arith.constant 0 : index
    %c0_8 = arith.constant 0 : index
    %20 = vector.load %arg3[%c0_7, %c0_8] : memref<1x32xf32, #tpu.memory_space<vmem>>, vector<1x32xf32>
    %21 = vector.broadcast %20 : vector<1x32xf32> to vector<16x32xf32>
    %22 = arith.addf %19, %21 : vector<16x32xf32>
    %c0_9 = arith.constant 0 : index
    %c0_10 = arith.constant 0 : index
    %23 = vector.load %arg4[%c0_9, %c0_10] : memref<32x32xf32, #tpu.memory_space<vmem>>, vector<32x32xf32>
    %cst_11 = arith.constant dense<0.000000e+00> : vector<16x32xf32>
    %24 = tpu.matmul %22, %23, %cst_11 {dimension_numbers = #tpu.dot_dimension_numbers<[1], [0], [0], [1], [0, 0, 1, 1], [], []>} : vector<16x32xf32>, vector<32x32xf32>, vector<16x32xf32> -> vector<16x32xf32>
    %c0_12 = arith.constant 0 : index
    %c0_13 = arith.constant 0 : index
    %25 = vector.load %arg5[%c0_12, %c0_13] : memref<1x32xf32, #tpu.memory_space<vmem>>, vector<1x32xf32>
    %26 = vector.broadcast %25 : vector<1x32xf32> to vector<16x32xf32>
    %27 = arith.addf %24, %26 : vector<16x32xf32>
    %c0_14 = arith.constant 0 : index
    %c0_15 = arith.constant 0 : index
    %28 = vector.load %arg6[%c0_14, %c0_15] : memref<16x32xf32, #tpu.memory_space<vmem>>, vector<16x32xf32>
    tpu.vector_store %arg6[%c0_14, %c0_15], %27 {strides = array<i32>} : memref<16x32xf32, #tpu.memory_space<vmem>>, vector<16x32xf32>,
    return
  }
  func.func @transform_0(%arg0: i32) -> (i32, i32) {
    %c0_i32 = arith.constant 0 : i32
    %c0_i32_0 = arith.constant 0 : i32
    return %arg0, %c0_i32 : i32, i32
  }
  func.func @transform_1(%arg0: i32) -> (i32, i32) {
    %c0_i32 = arith.constant 0 : i32
    %c0_i32_0 = arith.constant 0 : i32
    %c0_i32_1 = arith.constant 0 : i32
    return %c0_i32, %c0_i32_0 : i32, i32
  }
  func.func @transform_2(%arg0: i32) -> (i32, i32) {
    %c0_i32 = arith.constant 0 : i32
    %c0_i32_0 = arith.constant 0 : i32
    %c0_i32_1 = arith.constant 0 : i32
    return %c0_i32, %c0_i32_0 : i32, i32
  }
  func.func @transform_3(%arg0: i32) -> (i32, i32) {
    %c0_i32 = arith.constant 0 : i32
    %c0_i32_0 = arith.constant 0 : i32
    %c0_i32_1 = arith.constant 0 : i32
    return %c0_i32, %c0_i32_0 : i32, i32
  }
  func.func @transform_4(%arg0: i32) -> (i32, i32) {
    %c0_i32 = arith.constant 0 : i32
    %c0_i32_0 = arith.constant 0 : i32
    %c0_i32_1 = arith.constant 0 : i32
    return %c0_i32, %c0_i32_0 : i32, i32
  }
  func.func @transform_5(%arg0: i32) -> (i32, i32) {
    %c0_i32 = arith.constant 0 : i32
    %c0_i32_0 = arith.constant 0 : i32
    return %arg0, %c0_i32 : i32, i32
  }
}

</mosaic_0001>

<bundles_post_ra>
// kernel: prenorm_linear.1
= control target key start
LH: loop header
LB: loop body
LE: loop exit
PB: predicated region body
PF: predicated region fallthrough
CT: control target
= control target key end

     0   :  { %10 = vsyncpa [#allocation3], 0  ;;  %s387_s0 = inlined_call_operand.hbm [shape: f32[16,32], index: 0, kind: input, shape index: {}]   ;;  %s388_s1 = inlined_call_operand.vmem [shape: f32[1,32], index: 1, kind: input, shape index: {}]   ;;  %s389_s2 = inlined_call_operand.vmem [shape: f32[1,32], index: 2, kind: input, shape index: {}]   ;;  %s390_s3 = inlined_call_operand.hbm [shape: f32[32,32], index: 3, kind: input, shape index: {}]   ;;  %s391_s4 = inlined_call_operand.hbm [shape: f32[1,32], index: 4, kind: input, shape index: {}]   ;;  %s392_s5 = inlined_call_operand.hbm [shape: f32[16,32], index: 5, kind: output, shape index: {}]  }
   0x1   :  { %11 = vsyncpa [#allocation6], 0 }
   0x2   :  { %12 = vsyncpa [#allocation4], 0  ;;  %s34_s20 = sshll.u32 %s390_s3, 4  ;;  %s315_s21 = smov [#allocation5]   ;;  %s35_s20 = int_to_ptr.hbm [resolvable:$true] %s34_s20 }
   0x3   :  { %s36_s22 = sshll.u32 %s315_s21, 4  ;;  %s17_s25 = sshll.u32 %s387_s0, 4  ;;  %s37_s22 = int_to_ptr.vmem [resolvable:$true] %s36_s22  ;;  %s18_s25 = int_to_ptr.hbm [resolvable:$true] %s17_s25 }
   0x4   :  { %s316_s26 = smov 128   ;;  %s317_s27 = smov 8  }
   0x5   :  { %42 = dma.hbm_to_vmem [thread:$0]  %s35_s20, 512, %s37_s22, [#allocation6], %s316_s26, %s316_s26, %s317_s27  }
   0x6   :  { %s318_s28 = smov [#allocation2]   ;;  %s48_s3 = sshll.u32 %s391_s4, 4  ;;  %s49_s3 = int_to_ptr.hbm [resolvable:$true] %s48_s3 }
   0x7   :  { %s19_s29 = sshll.u32 %s318_s28, 4  ;;  %s319_s0 = smov [#allocation7]   ;;  %s20_s29 = int_to_ptr.vmem [resolvable:$true] %s19_s29 }
   0x8   :  { %25 = dma.hbm_to_vmem [thread:$0]  %s18_s25, 256, %s20_s29, [#allocation3], %s316_s26, %s316_s26, %s317_s27  }
   0x9   :  { %s50_s7 = sshll.u32 %s319_s0, 4  ;;  %s51_s7 = int_to_ptr.vmem [resolvable:$true] %s50_s7 }
   0xa   :  { %53 = dma.hbm_to_vmem [thread:$0]  %s49_s3, 16, %s51_s7, [#allocation6]  }
   0xb   :  { %309 = dma.done.wait [#allocation3], 256  }
   0xc   :  { %310 = vsyncadd [#allocation3], 4294967040 }
   0xd   :  { %311 = dma.done.wait [#allocation6], 528  }
   0xe   :  { %312 = vsyncadd [#allocation6], 4294966768  ;;  %vm68_vm0 = vcmask 261120   ;;  %v66_v0 = vld [vmem:[#allocation2] sm:$0xff]  ;;  %v67_v2 = vld [vmem:[#allocation2 + $0x8] sm:$0xff]  ;;  %v320_v4 = vmov 32.0  }
   0xf   :  { %v69_v1 = vsel %vm68_vm0, %v66_v0, 0.0  ;;  %v72_v3 = vsel %vm68_vm0, %v67_v2, 0.0  ;;  %207 = vrcp.f32 %v320_v4  ;;  %v135_v21 = vld [vmem:[#allocation5 + $0x18] sm:$0xff]  ;;  %v134_v22 = vld [vmem:[#allocation5 + $0x10] sm:$0xff]  ;;  %v133_v23 = vld [vmem:[#allocation5 + $0x8] sm:$0xff]  ;;  %s177_s13 = sshll.u32 %s392_s5, 4  ;;  %s178_s13 = int_to_ptr.hbm [resolvable:$true] %s177_s13 }
  0x10   :  { %70 = vadd.xlane.f32.xlu0 %v69_v1  ;;  %158 = vmatpush.msra.mxu0 %v135_v21  ;;  %v132_v24 = vld [vmem:[#allocation5] sm:$0xff]  ;;  %v204_v39 = vld [vmem:[%s388_s1] ss:$0 sm:$0xff]  ;;  %s321_s1 = smov [#allocation8]  }
  0x11   :  { %193 = vmatpush.msra.mxu1 %v135_v21  ;;  %v205_v43 = vld [vmem:[%s389_s2] ss:$0 sm:$0xff]  ;;  %v206_v53 = vld [vmem:[#allocation7] ss:$0 sm:$0xff]  ;;  %s175_s2 = sshll.u32 %s321_s1, 4  ;;  %s176_s2 = int_to_ptr.vmem [resolvable:$true] %s175_s2 }
  0x12   :  { %159 = vmatpush.msra.mxu0 %v134_v22 }
  0x13   :  { %194 = vmatpush.msra.mxu1 %v134_v22 }
  0x14   :  { %160 = vmatpush.msra.mxu0 %v133_v23 }
  0x15   :  { %v208_v5 = vpop.eup %207  ;;  %195 = vmatpush.msra.mxu1 %v133_v23 }
  0x16   :  { %v76_v6 = vmul.f32 32.0, %v208_v5  ;;  %vm80_vm1 = vweird.f32 %v208_v5  ;;  %161 = vmatpush.msra.mxu0 %v132_v24 }
  0x17   :  { %196 = vmatpush.msra.mxu1 %v132_v24 }
  0x18   :  { %73 = vadd.xlane.f32.xlu0 %v72_v3  ;;  %v77_v7 = vsub.f32 1.0, %v76_v6 }
  0x1a   :  { %v78_v8 = vmul.f32 %v208_v5, %v77_v7 }
  0x1c   :  { %v79_v9 = vadd.f32 %v208_v5, %v78_v8 }
  0x1e   :  { %v81_v10 = vsel %vm80_vm1, %v208_v5, %v79_v9 }
  0x83   :  { %v71_v11 = vpop.xlane.xlu0 %70 }
  0x84   :  { %v82_v12 = vmul.f32 %v81_v10, %v71_v11 }
  0x86   :  { %v84_v13 = vsub.f32 %v66_v0, %v82_v12 }
  0x88   :  { %v86_v14 = vmul.f32 %v84_v13, %v84_v13 }
  0x8a   :  { %v88_v15 = vsel %vm68_vm0, %v86_v14, 0.0 }
  0x8b   :  { %89 = vadd.xlane.f32.xlu1 %v88_v15  ;;  %v74_v16 = vpop.xlane.xlu0 %73 }
  0x8c   :  { %v83_v17 = vmul.f32 %v81_v10, %v74_v16 }
  0x8e   :  { %v85_v18 = vsub.f32 %v67_v2, %v83_v17 }
  0x90   :  { %v87_v19 = vmul.f32 %v85_v18, %v85_v18 }
  0x92   :  { %v91_v20 = vsel %vm68_vm0, %v87_v19, 0.0 }
  0x93   :  { %92 = vadd.xlane.f32.xlu1 %v91_v20 }
  0xfe   :  { %v90_v25 = vpop.xlane.xlu1 %89 }
  0xff   :  { %v94_v26 = vmul.f32 %v90_v25, %v81_v10 }
 0x101   :  { %v96_v27 = vadd.f32 1e-05, %v94_v26 }
 0x103   :  { %209 = vrsqrt.f32 %v96_v27  ;;  %vm104_vm3 = vweird.f32 %v96_v27 }
 0x106   :  { %v93_v28 = vpop.xlane.xlu1 %92 }
 0x107   :  { %v95_v29 = vmul.f32 %v93_v28, %v81_v10 }
 0x109   :  { %v210_v30 = vpop.eup %209  ;;  %v97_v31 = vadd.f32 1e-05, %v95_v29 }
 0x10a   :  { %v99_v32 = vmul.f32 %v210_v30, %v96_v27  ;;  %vm105_vm2 = vweird.f32 %v210_v30 }
 0x10b   :  { %211 = vrsqrt.f32 %v97_v31  ;;  %vm106_vm4 = vmor %vm104_vm3, %vm105_vm2  ;;  %vm114_vm6 = vweird.f32 %v97_v31 }
 0x10c   :  { %v100_v33 = vmul.f32 %v210_v30, %v99_v32 }
 0x10e   :  { %v101_v34 = vmul.f32 0.5, %v100_v33 }
 0x110   :  { %v102_v35 = vsub.f32 1.5, %v101_v34 }
 0x111   :  { %v212_v36 = vpop.eup %211 }
 0x112   :  { %v103_v37 = vmul.f32 %v210_v30, %v102_v35  ;;  %v109_v38 = vmul.f32 %v212_v36, %v97_v31  ;;  %vm115_vm5 = vweird.f32 %v212_v36 }
 0x113   :  { %vm116_vm7 = vmor %vm114_vm6, %vm115_vm5 }
 0x114   :  { %v107_v40 = vsel %vm106_vm4, %v210_v30, %v103_v37  ;;  %v110_v41 = vmul.f32 %v212_v36, %v109_v38 }
 0x115   :  { %v118_v42 = vmul.f32 %v107_v40, %v84_v13 }
 0x116   :  { %v111_v44 = vmul.f32 0.5, %v110_v41 }
 0x117   :  { %v124_v45 = vmul.f32 %v204_v39, %v118_v42 }
 0x118   :  { %v112_v46 = vsub.f32 1.5, %v111_v44 }
 0x119   :  { %v130_v47 = vadd.f32 %v205_v43, %v124_v45 }
 0x11a   :  { %v113_v48 = vmul.f32 %v212_v36, %v112_v46 }
 0x11b   :  { %191 = vmatmul.msk.f32.vlgmr.msra.gmra.mxu0 %vm68_vm0, %v130_v47 }
 0x11c   :  { %v117_v49 = vsel %vm116_vm7, %v212_v36, %v113_v48 }
 0x11d   :  { %v119_v50 = vmul.f32 %v117_v49, %v85_v18 }
 0x11f   :  { %v125_v51 = vmul.f32 %v204_v39, %v119_v50 }
 0x121   :  { %v131_v52 = vadd.f32 %v205_v43, %v125_v51 }
 0x123   :  { %192 = vmatmul.msk.f32.vlgmr.msra.gmra.mxu1 %vm68_vm0, %v131_v52 }
 0x198   :  { %v163_v54 = vpop.f32.mrf.mxu0 }
 0x199   :  { %v164_v55 = vadd.f32 %v206_v53, %v163_v54 }
 0x19b   :  { %169 = vst.msk [vmem:[#allocation8] sm:$0xff] %vm68_vm0, %v164_v55 }
 0x1a0   :  { %v166_v56 = vpop.f32.mrf.mxu1 }
 0x1a1   :  { %v167_v57 = vadd.f32 %v206_v53, %v166_v56 }
 0x1a3   :  { %170 = vst.msk [vmem:[#allocation8 + $0x8] sm:$0xff] %vm68_vm0, %v167_v57 }
 0x1a4   :  { %183 = dma.vmem_to_hbm [thread:$0]  %s176_s2, 256, %s178_s13, [#allocation4], %s316_s26, %s316_s26, %s317_s27  }
 0x1a5   :  { %313 = dma.done.wait [#allocation4], 256  }
 0x1a6   :  { %314 = vsyncadd [#allocation4], 4294967040 }
 0x1a7   :  { %188 = vsyncpa [#allocation3], 1 }
 0x1a8   :  { %189 = vsyncpa [#allocation6], 1 }
 0x1a9   :  { %190 = vsyncpa [#allocation4], 1 }

</bundles_post_ra>
